<compile_context>
chip_gen: v7x
topology: tpu7x:2x2x1
jax: 0.10.0
libtpu: 0.0.40
codegen_flags: <defaults>
</compile_context>

<pallas_src>
import functools

import jax
import jax.numpy as jnp
from jax import lax
from jax.experimental import pallas as pl
from jax.experimental.pallas import tpu as pltpu

BN_EPS = 1e-5
LANE = 128


def _round_up(x, m):
    return (x + m - 1) // m * m


def _default_vmem_limit():
    # ~3/4 of physical VMEM: ~96 MiB on v5e/v6e (128 MiB), 48 MiB on v7x (64 MiB).
    try:
        cap = int(pltpu.get_tpu_info().vmem_capacity_bytes)
        return max(32 * 1024 * 1024, (cap * 3) // 4)
    except Exception:
        return 48 * 1024 * 1024


VMEM_LIMIT = _default_vmem_limit()


# ----------------------------- Pallas kernels --------------------------------
def _conv3x3_stats_kernel(x_ref, w_ref, y_ref, s1_ref, s2_ref, *, stride, ho, wo, hph):
    """One image per grid step: 3x3/pad=1 conv as 9 shifted contiguous matmuls (in-kernel
    im2col) accumulated in f32, plus per-image per-channel sum / sum-of-squares partials.

    x_ref : (1, s*s*hph, wph, cin_p)  stride-phase planes of the spatially padded image
    w_ref : (9, cin_p, cp)            per-tap weight matrices (k = ky*3 + kx)
    y_ref : (1, ho*wo, cp)  f32       raw conv output
    s1/s2 : (1, 1, cp)      f32       per-image partial sum / sumsq (reduced in the wrapper)
    """
    cp = w_ref.shape[-1]
    cin_p = w_ref.shape[-2]
    acc = jnp.zeros((ho * wo, cp), jnp.float32)
    for ky in range(3):
        for kx in range(3):
            p_idx = (ky % stride) * stride + (kx % stride)  # which phase plane
            oy, ox = ky // stride, kx // stride             # offset inside the plane
            patch = x_ref[0, pl.ds(p_idx * hph + oy, ho), pl.ds(ox, wo), :]
            acc += jnp.dot(patch.reshape(ho * wo, cin_p), w_ref[ky * 3 + kx],
                           preferred_element_type=jnp.float32)
    y_ref[0] = acc
    s1_ref[0] = jnp.sum(acc, axis=0, keepdims=True)
    s2_ref[0] = jnp.sum(acc * acc, axis=0, keepdims=True)


def _matmul_stats_kernel(p_ref, w_ref, y_ref, s1_ref, s2_ref):
    """Row-tiled plain matmul (1x1 shortcut conv) + per-tile stats partials ("parallel" grid)."""
    y = jnp.dot(p_ref[...], w_ref[...], preferred_element_type=jnp.float32)
    y_ref[...] = y
    s1_ref[0] = jnp.sum(y, axis=0, keepdims=True)
    s2_ref[0] = jnp.sum(y * y, axis=0, keepdims=True)


def _affine_relu_kernel(y_ref, scale_ref, shift_ref, o_ref):
    """out = relu(y * scale + shift), cast to o_ref.dtype (bf16 inter-conv stream)."""
    v = y_ref[...] * scale_ref[...] + shift_ref[...]
    o_ref[...] = jnp.maximum(v, 0.0).astype(o_ref.dtype)


def _residual_epilogue_kernel(y_ref, sc_ref, sh_ref, r_ref, rsc_ref, rsh_ref, o_ref):
    """out = relu(y*sc+sh + r*rsc+rsh): BN2 affine + (BN'd or identity) shortcut + ReLU."""
    v = (y_ref[...] * sc_ref[...] + sh_ref[...]
         + r_ref[...].astype(jnp.float32) * rsc_ref[...] + rsh_ref[...])
    o_ref[...] = jnp.maximum(v, 0.0).astype(o_ref.dtype)


# ------------------------------- wrappers ------------------------------------
def _make_phases(x_nhwc, stride, cin_p):
    """Spatial 1-padding + channel padding + split into stride*stride phase planes so every
    3x3 tap becomes a contiguous in-kernel slice.  Total size ~1x the input (no 9x blowup)."""
    n, h, w, c = x_nhwc.shape
    ho = (h - 1) // stride + 1
    wo = (w - 1) // stride + 1
    hph = max(ho + 2 // stride, -(-(h + 2) // stride))
    wph = max(wo + 2 // stride, -(-(w + 2) // stride))
    hp, wp = stride * hph, stride * wph
    xp = jnp.pad(x_nhwc, ((0, 0), (1, hp - h - 1), (1, wp - w - 1), (0, cin_p - c)))
    planes = [xp[:, a::stride, b::stride, :] for a in range(stride) for b in range(stride)]
    phases = jnp.stack(planes, axis=1).reshape(n, stride * stride * hph, wph, cin_p)
    return phases, ho, wo, hph, wph


def _weight_to_w9(w_oihw, cin_p, cout_p):
    """(Cout, Cin, 3, 3) -> (9, cin_p, cout_p), k = ky*3 + kx, zero padded channels."""
    cout, cin, kh, kw = w_oihw.shape
    w = jnp.pad(w_oihw, ((0, cout_p - cout), (0, cin_p - cin), (0, 0), (0, 0)))
    return jnp.transpose(w, (2, 3, 1, 0)).reshape(kh * kw, cin_p, cout_p)


def _pad_cols(a, cp, value=0.0):
    pad = cp - a.shape[1]
    return a if pad == 0 else jnp.pad(a, ((0, 0), (0, pad)), constant_values=value)


def conv3x3_stats(x_nhwc, w_oihw, stride, cout_p, compute_dtype):
    """Conv+BN pass 1: raw conv output y (M, cout_p) f32 and per-channel partial sums."""
    n, h, w, cin = x_nhwc.shape
    cin_p = _round_up(max(cin, 8), 8)
    phases, ho, wo, hph, wph = _make_phases(x_nhwc, stride, cin_p)
    phases = phases.astype(compute_dtype)
    w9 = _weight_to_w9(w_oihw, cin_p, cout_p).astype(compute_dtype)
    m = n * ho * wo
    ph_rows = stride * stride * hph

    # TODO(synk): grid is one image per step; for very large feature maps add output-row-band
    # tiling with manual halo DMA (memory_space=pl.ANY) so each block stays VMEM-bounded.
    kern = functools.partial(_conv3x3_stats_kernel, stride=stride, ho=ho, wo=wo, hph=hph)
    y, s1, s2 = pl.pallas_call(
        kern,
        out_shape=(
            jax.ShapeDtypeStruct((n, ho * wo, cout_p), jnp.float32),
            jax.ShapeDtypeStruct((n, 1, cout_p), jnp.float32),
            jax.ShapeDtypeStruct((n, 1, cout_p), jnp.float32),
        ),
        grid=(n,),
        in_specs=[
            pl.BlockSpec((1, ph_rows, wph, cin_p), lambda i: (i, 0, 0, 0)),
            pl.BlockSpec((9, cin_p, cout_p), lambda i: (0, 0, 0)),
        ],
        out_specs=(
            pl.BlockSpec((1, ho * wo, cout_p), lambda i: (i, 0, 0)),
            pl.BlockSpec((1, 1, cout_p), lambda i: (i, 0, 0)),
            pl.BlockSpec((1, 1, cout_p), lambda i: (i, 0, 0)),
        ),
        compiler_params=pltpu.CompilerParams(
            dimension_semantics=("parallel",), vmem_limit_bytes=VMEM_LIMIT),
        cost_estimate=pl.CostEstimate(
            flops=2 * m * 9 * cin_p * cout_p,
            transcendentals=0,
            bytes_accessed=(phases.size * phases.dtype.itemsize
                            + n * w9.size * w9.dtype.itemsize
                            + 4 * m * cout_p + 8 * n * cout_p)),
    )(phases, w9)
    return y.reshape(m, cout_p), s1, s2, (n, ho, wo)


def matmul_stats(patches, w_mat, *, block_m=256):
    """1x1 conv (shortcut) pass 1: row-tiled matmul + per-tile stats partials."""
    m_true, kd = patches.shape
    cp = w_mat.shape[1]
    tm = min(block_m, _round_up(m_true, 8))
    m_pad = _round_up(m_true, tm)
    if m_pad != m_true:
        patches = jnp.pad(patches, ((0, m_pad - m_true), (0, 0)))
    g = m_pad // tm
    y, s1, s2 = pl.pallas_call(
        _matmul_stats_kernel,
        out_shape=(
            jax.ShapeDtypeStruct((m_pad, cp), jnp.float32),
            jax.ShapeDtypeStruct((g, 1, cp), jnp.float32),
            jax.ShapeDtypeStruct((g, 1, cp), jnp.float32),
        ),
        grid=(g,),
        in_specs=[
            pl.BlockSpec((tm, kd), lambda i: (i, 0)),
            pl.BlockSpec((kd, cp), lambda i: (0, 0)),
        ],
        out_specs=(
            pl.BlockSpec((tm, cp), lambda i: (i, 0)),
            pl.BlockSpec((1, 1, cp), lambda i: (i, 0, 0)),
            pl.BlockSpec((1, 1, cp), lambda i: (i, 0, 0)),
        ),
        compiler_params=pltpu.CompilerParams(
            dimension_semantics=("parallel",), vmem_limit_bytes=VMEM_LIMIT),
    )(patches, w_mat)
    return y[:m_true], s1, s2


def _fold_bn(s1, s2, m_true, gamma_p, beta_p):
    """Fold batch statistics into per-channel scale/shift (f32).  Padded channels carry
    gamma=0 / beta=0 so they map to exactly 0 regardless of their (zero-variance) stats."""
    s1 = jnp.sum(s1, axis=(0, 1))[None, :]
    s2 = jnp.sum(s2, axis=(0, 1))[None, :]
    mean = s1 / float(m_true)
    # TODO(synk): E[x^2]-E[x]^2 in f32 is fine at these sizes; use a Welford-style per-block
    # combine for very large feature maps.
    var = jnp.maximum(s2 / float(m_true) - mean * mean, 0.0)
    scale = gamma_p * lax.rsqrt(var + BN_EPS)
    shift = beta_p - mean * scale
    return scale, shift


def affine_relu(y, scale, shift, *, out_dtype, block_m=1024):
    """Conv1 pass 2: BN affine + ReLU, large row tiles, output in the matmul compute dtype."""
    m_true, cp = y.shape
    tm = min(block_m, _round_up(m_true, 8))
    m_pad = _round_up(m_true, tm)
    if m_pad != m_true:
        y = jnp.pad(y, ((0, m_pad - m_true), (0, 0)))
    out = pl.pallas_call(
        _affine_relu_kernel,
        out_shape=jax.ShapeDtypeStruct((m_pad, cp), out_dtype),
        grid=(m_pad // tm,),
        in_specs=[
            pl.BlockSpec((tm, cp), lambda i: (i, 0)),
            pl.BlockSpec((1, cp), lambda i: (0, 0)),
            pl.BlockSpec((1, cp), lambda i: (0, 0)),
        ],
        out_specs=pl.BlockSpec((tm, cp), lambda i: (i, 0)),
        compiler_params=pltpu.CompilerParams(
            dimension_semantics=("parallel",), vmem_limit_bytes=VMEM_LIMIT),
    )(y, scale, shift)
    return out[:m_true]


def residual_epilogue(y, scale, shift, res, rscale, rshift, *, block_m=1024):
    """Final fused epilogue: BN2 affine + shortcut affine + add + ReLU."""
    m_true, cp = y.shape
    tm = min(block_m, _round_up(m_true, 8))
    m_pad = _round_up(m_true, tm)
    if m_pad != m_true:
        y = jnp.pad(y, ((0, m_pad - m_true), (0, 0)))
        res = jnp.pad(res, ((0, m_pad - m_true), (0, 0)))
    out = pl.pallas_call(
        _residual_epilogue_kernel,
        out_shape=jax.ShapeDtypeStruct((m_pad, cp), jnp.float32),
        grid=(m_pad // tm,),
        in_specs=[
            pl.BlockSpec((tm, cp), lambda i: (i, 0)),
            pl.BlockSpec((1, cp), lambda i: (0, 0)),
            pl.BlockSpec((1, cp), lambda i: (0, 0)),
            pl.BlockSpec((tm, cp), lambda i: (i, 0)),
            pl.BlockSpec((1, cp), lambda i: (0, 0)),
            pl.BlockSpec((1, cp), lambda i: (0, 0)),
        ],
        out_specs=pl.BlockSpec((tm, cp), lambda i: (i, 0)),
        compiler_params=pltpu.CompilerParams(
            dimension_semantics=("parallel",), vmem_limit_bytes=VMEM_LIMIT),
    )(y, scale, shift, res, rscale, rshift)
    return out[:m_true]


# ------------------------------ full forward ----------------------------------
def residual_block_forward(x_nchw, params, stride, *, compute_dtype=jnp.float32,
                           block_m=256, ep_block_m=1024):
    x = jnp.transpose(x_nchw, (0, 2, 3, 1)).astype(jnp.float32)      # NHWC
    n, h, w, cin = x.shape
    cout = params["w1"].shape[0]
    cp = _round_up(cout, LANE)                                        # lane-dense channel pad

    g1 = _pad_cols(params["g1"], cp); b1 = _pad_cols(params["b1"], cp)
    g2 = _pad_cols(params["g2"], cp); b2 = _pad_cols(params["b2"], cp)

    # ---- conv1 (3x3, stride) pass 1: in-kernel im2col matmul + stats ----
    y1, p1a, p1b, (_, ho, wo) = conv3x3_stats(x, params["w1"], stride, cp, compute_dtype)
    m = n * ho * wo
    scale1, shift1 = _fold_bn(p1a, p1b, m, g1, b1)
    # ---- conv1 pass 2: BN affine + ReLU, emitted directly as the conv2 input stream ----
    # TODO(synk): fold this affine+ReLU into conv2's pass-1 (consume y1 tiles in-kernel) to
    # remove the remaining conv1->conv2 HBM round trip.
    out1 = affine_relu(y1, scale1, shift1, out_dtype=compute_dtype, block_m=ep_block_m)

    # ---- shortcut ----
    if stride != 1 or cin != cout:
        cin_p = _round_up(max(cin, 8), 8)
        xs = jnp.pad(x[:, ::stride, ::stride, :], ((0, 0), (0, 0), (0, 0), (0, cin_p - cin)))
        xs = xs.reshape(m, cin_p).astype(compute_dtype)
        ws = params["ws"][:, :, 0, 0]
        wsm = jnp.pad(ws, ((0, cp - cout), (0, cin_p - cin))).T.astype(compute_dtype)
        ys, psa, psb = matmul_stats(xs, wsm, block_m=block_m)
        rscale, rshift = _fold_bn(psa, psb, m, _pad_cols(params["gs"], cp),
                                  _pad_cols(params["bs"], cp))
        res = ys        # shortcut BN is folded into conv2's epilogue (no separate pass 2)
    else:
        res = jnp.pad(x, ((0, 0), (0, 0), (0, 0), (0, cp - cin))).reshape(m, cp)
        rscale = _pad_cols(jnp.ones((1, cout), jnp.float32), cp)
        rshift = jnp.zeros((1, cp), jnp.float32)

    # ---- conv2 (3x3, stride 1) pass 1 ----
    out1_nhwc = out1.reshape(n, ho, wo, cp)
    y2, p2a, p2b, _ = conv3x3_stats(out1_nhwc, params["w2"], 1, cp, compute_dtype)
    scale2, shift2 = _fold_bn(p2a, p2b, m, g2, b2)

    # ---- fused epilogue: BN2 affine + shortcut (BN'd or identity) + add + ReLU ----
    out = residual_epilogue(y2, scale2, shift2, res, rscale, rshift, block_m=ep_block_m)

    out = out.reshape(n, ho, wo, cp)[..., :cout]
    return jnp.transpose(out, (0, 3, 1, 2))                           # back to NCHW


# --------------------------- pure-JAX reference --------------------------------
def _bn_ref(y, g, b):
    m = jnp.mean(y, axis=(0, 2, 3), keepdims=True)
    v = jnp.mean(jnp.square(y - m), axis=(0, 2, 3), keepdims=True)
    return (y - m) * lax.rsqrt(v + BN_EPS) * g.reshape(1, -1, 1, 1) + b.reshape(1, -1, 1, 1)


def ref_forward(x, params, stride):
    hi = lax.Precision.HIGHEST
    dn = ("NCHW", "OIHW", "NCHW")
    out = lax.conv_general_dilated(x, params["w1"], (stride, stride), ((1, 1), (1, 1)),
                                   dimension_numbers=dn, precision=hi)
    out = jnp.maximum(_bn_ref(out, params["g1"], params["b1"]), 0.0)
    out = lax.conv_general_dilated(out, params["w2"], (1, 1), ((1, 1), (1, 1)),
                                   dimension_numbers=dn, precision=hi)
    out = _bn_ref(out, params["g2"], params["b2"])
    if stride != 1 or x.shape[1] != params["w1"].shape[0]:
        sc = lax.conv_general_dilated(x, params["ws"], (stride, stride), ((0, 0), (0, 0)),
                                      dimension_numbers=dn, precision=hi)
        sc = _bn_ref(sc, params["gs"], params["bs"])
    else:
        sc = x
    return jnp.maximum(out + sc, 0.0)


# ----------------------------------- main --------------------------------------
if __name__ == "__main__":
    # --- test 1: downsample block (stride=2, Cin != Cout) -> projection-shortcut path ---
    N, Cin, H, W = 2, 4, 16, 16
    Cout, stride = 8, 2
    ks = jax.random.split(jax.random.PRNGKey(0), 8)
    params = {
        "w1": 0.1 * jax.random.normal(ks[0], (Cout, Cin, 3, 3), jnp.float32),
        "g1": 1.0 + 0.1 * jax.random.normal(ks[1], (1, Cout), jnp.float32),
        "b1": 0.1 * jax.random.normal(ks[2], (1, Cout), jnp.float32),
        "w2": 0.1 * jax.random.normal(ks[3], (Cout, Cout, 3, 3), jnp.float32),
        "g2": 1.0 + 0.1 * jax.random.normal(ks[4], (1, Cout), jnp.float32),
        "b2": 0.1 * jax.random.normal(ks[5], (1, Cout), jnp.float32),
        "ws": 0.1 * jax.random.normal(ks[6], (Cout, Cin, 1, 1), jnp.float32),
        "gs": jnp.ones((1, Cout), jnp.float32),
        "bs": jnp.zeros((1, Cout), jnp.float32),
    }
    x = jax.random.normal(jax.random.PRNGKey(1), (N, Cin, H, W), jnp.float32)
    ref = jax.block_until_ready(ref_forward(x, params, stride))

    # exact-precision path (validates kernel logic against the PyTorch semantics)
    out = jax.block_until_ready(
        residual_block_forward(x, params, stride, compute_dtype=jnp.float32))
    assert out.shape == ref.shape == (N, Cout, H // stride, W // stride)
    assert jnp.allclose(out, ref, atol=2e-3, rtol=2e-3), (
        f"f32 max abs err = {jnp.max(jnp.abs(out - ref))}")

    # bf16 MXU path (performance configuration): bf16 operands, f32 accumulation / BN math
    out_bf16 = jax.block_until_ready(
        residual_block_forward(x, params, stride, compute_dtype=jnp.bfloat16))
    assert jnp.allclose(out_bf16, ref, atol=1e-1, rtol=1e-1), (
        f"bf16 max abs err = {jnp.max(jnp.abs(out_bf16 - ref))}")

    # --- test 2: identity-shortcut block (stride=1, Cin == Cout) ---
    C2 = 8
    ks2 = jax.random.split(jax.random.PRNGKey(2), 6)
    params2 = {
        "w1": 0.1 * jax.random.normal(ks2[0], (C2, C2, 3, 3), jnp.float32),
        "g1": 1.0 + 0.1 * jax.random.normal(ks2[1], (1, C2), jnp.float32),
        "b1": 0.1 * jax.random.normal(ks2[2], (1, C2), jnp.float32),
        "w2": 0.1 * jax.random.normal(ks2[3], (C2, C2, 3, 3), jnp.float32),
        "g2": 1.0 + 0.1 * jax.random.normal(ks2[4], (1, C2), jnp.float32),
        "b2": 0.1 * jax.random.normal(ks2[5], (1, C2), jnp.float32),
    }
    x2 = jax.random.normal(jax.random.PRNGKey(3), (N, C2, H, W), jnp.float32)
    ref2 = jax.block_until_ready(ref_forward(x2, params2, 1))
    out2 = jax.block_until_ready(
        residual_block_forward(x2, params2, 1, compute_dtype=jnp.float32))
    assert out2.shape == ref2.shape == (N, C2, H, W)
    assert jnp.allclose(out2, ref2, atol=2e-3, rtol=2e-3), (
        f"identity path max abs err = {jnp.max(jnp.abs(out2 - ref2))}")

    print("KERNEL_OK")
</pallas_src>

<mosaic_0001>
module attributes {stable_mosaic.version = 11 : i64} {
  func.func @_conv3x3_stats_kernel(%arg0: i32, %arg1: memref<1x36x9x8xf32, #tpu.memory_space<vmem>>, %arg2: memref<9x8x128xf32, #tpu.memory_space<vmem>>, %arg3: memref<1x64x128xf32, #tpu.memory_space<vmem>>, %arg4: memref<1x1x128xf32, #tpu.memory_space<vmem>>, %arg5: memref<1x1x128xf32, #tpu.memory_space<vmem>>) attributes {dimension_semantics = [#tpu.dimension_semantics<parallel>], iteration_bounds = array<i64: 2>, scalar_prefetch = 0 : i64, scratch_operands = 0 : i64, tpu.core_type = #tpu.core_type<tc>, window_params = [{transform_indices = @transform_0, window_bounds = array<i64: 1, 36, 9, 8>}, {pipeline_mode = #tpu.pipeline_mode<synchronous>, transform_indices = @transform_1, window_bounds = array<i64: 9, 8, 128>}, {transform_indices = @transform_2, window_bounds = array<i64: 1, 64, 128>}, {transform_indices = @transform_3, window_bounds = array<i64: 1, 1, 128>}, {transform_indices = @transform_4, window_bounds = array<i64: 1, 1, 128>}]} {
    %cst = arith.constant 0.000000e+00 : f32
    %0 = vector.broadcast %cst : f32 to vector<64x128xf32>
    %c0 = arith.constant 0 : index
    %c0_0 = arith.constant 0 : index
    %c0_1 = arith.constant 0 : index
    %c0_2 = arith.constant 0 : index
    %1 = vector.load %arg1[%c0, %c0_0, %c0_1, %c0_2] : memref<1x36x9x8xf32, #tpu.memory_space<vmem>>, vector<1x8x8x8xf32>
    %2 = vector.shape_cast %1 : vector<1x8x8x8xf32> to vector<8x8x8xf32>
    %3 = vector.shape_cast %2 : vector<8x8x8xf32> to vector<64x8xf32>
    %c0_3 = arith.constant 0 : index
    %c0_4 = arith.constant 0 : index
    %c0_5 = arith.constant 0 : index
    %4 = vector.load %arg2[%c0_3, %c0_4, %c0_5] : memref<9x8x128xf32, #tpu.memory_space<vmem>>, vector<1x8x128xf32>
    %5 = vector.shape_cast %4 : vector<1x8x128xf32> to vector<8x128xf32>
    %cst_6 = arith.constant dense<0.000000e+00> : vector<64x128xf32>
    %6 = tpu.matmul %3, %5, %cst_6 {dimension_numbers = #tpu.dot_dimension_numbers<[1], [0], [0], [1], [0, 0, 1, 1], [], []>} : vector<64x8xf32>, vector<8x128xf32>, vector<64x128xf32> -> vector<64x128xf32>
    %7 = arith.addf %0, %6 : vector<64x128xf32>
    %c0_7 = arith.constant 0 : index
    %c9 = arith.constant 9 : index
    %c0_8 = arith.constant 0 : index
    %c0_9 = arith.constant 0 : index
    %8 = vector.load %arg1[%c0_7, %c9, %c0_8, %c0_9] : memref<1x36x9x8xf32, #tpu.memory_space<vmem>>, vector<1x8x8x8xf32>
    %9 = vector.shape_cast %8 : vector<1x8x8x8xf32> to vector<8x8x8xf32>
    %10 = vector.shape_cast %9 : vector<8x8x8xf32> to vector<64x8xf32>
    %c1 = arith.constant 1 : index
    %c0_10 = arith.constant 0 : index
    %c0_11 = arith.constant 0 : index
    %11 = vector.load %arg2[%c1, %c0_10, %c0_11] : memref<9x8x128xf32, #tpu.memory_space<vmem>>, vector<1x8x128xf32>
    %12 = vector.shape_cast %11 : vector<1x8x128xf32> to vector<8x128xf32>
    %cst_12 = arith.constant dense<0.000000e+00> : vector<64x128xf32>
    %13 = tpu.matmul %10, %12, %cst_12 {dimension_numbers = #tpu.dot_dimension_numbers<[1], [0], [0], [1], [0, 0, 1, 1], [], []>} : vector<64x8xf32>, vector<8x128xf32>, vector<64x128xf32> -> vector<64x128xf32>
    %14 = arith.addf %7, %13 : vector<64x128xf32>
    %c0_13 = arith.constant 0 : index
    %c0_14 = arith.constant 0 : index
    %c1_15 = arith.constant 1 : index
    %c0_16 = arith.constant 0 : index
    %15 = vector.load %arg1[%c0_13, %c0_14, %c1_15, %c0_16] : memref<1x36x9x8xf32, #tpu.memory_space<vmem>>, vector<1x8x8x8xf32>
    %16 = vector.shape_cast %15 : vector<1x8x8x8xf32> to vector<8x8x8xf32>
    %17 = vector.shape_cast %16 : vector<8x8x8xf32> to vector<64x8xf32>
    %c2 = arith.constant 2 : index
    %c0_17 = arith.constant 0 : index
    %c0_18 = arith.constant 0 : index
    %18 = vector.load %arg2[%c2, %c0_17, %c0_18] : memref<9x8x128xf32, #tpu.memory_space<vmem>>, vector<1x8x128xf32>
    %19 = vector.shape_cast %18 : vector<1x8x128xf32> to vector<8x128xf32>
    %cst_19 = arith.constant dense<0.000000e+00> : vector<64x128xf32>
    %20 = tpu.matmul %17, %19, %cst_19 {dimension_numbers = #tpu.dot_dimension_numbers<[1], [0], [0], [1], [0, 0, 1, 1], [], []>} : vector<64x8xf32>, vector<8x128xf32>, vector<64x128xf32> -> vector<64x128xf32>
    %21 = arith.addf %14, %20 : vector<64x128xf32>
    %c0_20 = arith.constant 0 : index
    %c18 = arith.constant 18 : index
    %c0_21 = arith.constant 0 : index
    %c0_22 = arith.constant 0 : index
    %22 = vector.load %arg1[%c0_20, %c18, %c0_21, %c0_22] : memref<1x36x9x8xf32, #tpu.memory_space<vmem>>, vector<1x8x8x8xf32>
    %23 = vector.shape_cast %22 : vector<1x8x8x8xf32> to vector<8x8x8xf32>
    %24 = vector.shape_cast %23 : vector<8x8x8xf32> to vector<64x8xf32>
    %c3 = arith.constant 3 : index
    %c0_23 = arith.constant 0 : index
    %c0_24 = arith.constant 0 : index
    %25 = vector.load %arg2[%c3, %c0_23, %c0_24] : memref<9x8x128xf32, #tpu.memory_space<vmem>>, vector<1x8x128xf32>
    %26 = vector.shape_cast %25 : vector<1x8x128xf32> to vector<8x128xf32>
    %cst_25 = arith.constant dense<0.000000e+00> : vector<64x128xf32>
    %27 = tpu.matmul %24, %26, %cst_25 {dimension_numbers = #tpu.dot_dimension_numbers<[1], [0], [0], [1], [0, 0, 1, 1], [], []>} : vector<64x8xf32>, vector<8x128xf32>, vector<64x128xf32> -> vector<64x128xf32>
    %28 = arith.addf %21, %27 : vector<64x128xf32>
    %c0_26 = arith.constant 0 : index
    %c27 = arith.constant 27 : index
    %c0_27 = arith.constant 0 : index
    %c0_28 = arith.constant 0 : index
    %29 = vector.load %arg1[%c0_26, %c27, %c0_27, %c0_28] : memref<1x36x9x8xf32, #tpu.memory_space<vmem>>, vector<1x8x8x8xf32>
    %30 = vector.shape_cast %29 : vector<1x8x8x8xf32> to vector<8x8x8xf32>
    %31 = vector.shape_cast %30 : vector<8x8x8xf32> to vector<64x8xf32>
    %c4 = arith.constant 4 : index
    %c0_29 = arith.constant 0 : index
    %c0_30 = arith.constant 0 : index
    %32 = vector.load %arg2[%c4, %c0_29, %c0_30] : memref<9x8x128xf32, #tpu.memory_space<vmem>>, vector<1x8x128xf32>
    %33 = vector.shape_cast %32 : vector<1x8x128xf32> to vector<8x128xf32>
    %cst_31 = arith.constant dense<0.000000e+00> : vector<64x128xf32>
    %34 = tpu.matmul %31, %33, %cst_31 {dimension_numbers = #tpu.dot_dimension_numbers<[1], [0], [0], [1], [0, 0, 1, 1], [], []>} : vector<64x8xf32>, vector<8x128xf32>, vector<64x128xf32> -> vector<64x128xf32>
    %35 = arith.addf %28, %34 : vector<64x128xf32>
    %c0_32 = arith.constant 0 : index
    %c18_33 = arith.constant 18 : index
    %c1_34 = arith.constant 1 : index
    %c0_35 = arith.constant 0 : index
    %36 = vector.load %arg1[%c0_32, %c18_33, %c1_34, %c0_35] : memref<1x36x9x8xf32, #tpu.memory_space<vmem>>, vector<1x8x8x8xf32>
    %37 = vector.shape_cast %36 : vector<1x8x8x8xf32> to vector<8x8x8xf32>
    %38 = vector.shape_cast %37 : vector<8x8x8xf32> to vector<64x8xf32>
    %c5 = arith.constant 5 : index
    %c0_36 = arith.constant 0 : index
    %c0_37 = arith.constant 0 : index
    %39 = vector.load %arg2[%c5, %c0_36, %c0_37] : memref<9x8x128xf32, #tpu.memory_space<vmem>>, vector<1x8x128xf32>
    %40 = vector.shape_cast %39 : vector<1x8x128xf32> to vector<8x128xf32>
    %cst_38 = arith.constant dense<0.000000e+00> : vector<64x128xf32>
    %41 = tpu.matmul %38, %40, %cst_38 {dimension_numbers = #tpu.dot_dimension_numbers<[1], [0], [0], [1], [0, 0, 1, 1], [], []>} : vector<64x8xf32>, vector<8x128xf32>, vector<64x128xf32> -> vector<64x128xf32>
    %42 = arith.addf %35, %41 : vector<64x128xf32>
    %c0_39 = arith.constant 0 : index
    %c1_40 = arith.constant 1 : index
    %c0_41 = arith.constant 0 : index
    %c0_42 = arith.constant 0 : index
    %43 = vector.load %arg1[%c0_39, %c1_40, %c0_41, %c0_42] : memref<1x36x9x8xf32, #tpu.memory_space<vmem>>, vector<1x8x8x8xf32>
    %44 = vector.shape_cast %43 : vector<1x8x8x8xf32> to vector<8x8x8xf32>
    %45 = vector.shape_cast %44 : vector<8x8x8xf32> to vector<64x8xf32>
    %c6 = arith.constant 6 : index
    %c0_43 = arith.constant 0 : index
    %c0_44 = arith.constant 0 : index
    %46 = vector.load %arg2[%c6, %c0_43, %c0_44] : memref<9x8x128xf32, #tpu.memory_space<vmem>>, vector<1x8x128xf32>
    %47 = vector.shape_cast %46 : vector<1x8x128xf32> to vector<8x128xf32>
    %cst_45 = arith.constant dense<0.000000e+00> : vector<64x128xf32>
    %48 = tpu.matmul %45, %47, %cst_45 {dimension_numbers = #tpu.dot_dimension_numbers<[1], [0], [0], [1], [0, 0, 1, 1], [], []>} : vector<64x8xf32>, vector<8x128xf32>, vector<64x128xf32> -> vector<64x128xf32>
    %49 = arith.addf %42, %48 : vector<64x128xf32>
    %c0_46 = arith.constant 0 : index
    %c10 = arith.constant 10 : index
    %c0_47 = arith.constant 0 : index
    %c0_48 = arith.constant 0 : index
    %50 = vector.load %arg1[%c0_46, %c10, %c0_47, %c0_48] : memref<1x36x9x8xf32, #tpu.memory_space<vmem>>, vector<1x8x8x8xf32>
    %51 = vector.shape_cast %50 : vector<1x8x8x8xf32> to vector<8x8x8xf32>
    %52 = vector.shape_cast %51 : vector<8x8x8xf32> to vector<64x8xf32>
    %c7 = arith.constant 7 : index
    %c0_49 = arith.constant 0 : index
    %c0_50 = arith.constant 0 : index
    %53 = vector.load %arg2[%c7, %c0_49, %c0_50] : memref<9x8x128xf32, #tpu.memory_space<vmem>>, vector<1x8x128xf32>
    %54 = vector.shape_cast %53 : vector<1x8x128xf32> to vector<8x128xf32>
    %cst_51 = arith.constant dense<0.000000e+00> : vector<64x128xf32>
    %55 = tpu.matmul %52, %54, %cst_51 {dimension_numbers = #tpu.dot_dimension_numbers<[1], [0], [0], [1], [0, 0, 1, 1], [], []>} : vector<64x8xf32>, vector<8x128xf32>, vector<64x128xf32> -> vector<64x128xf32>
    %56 = arith.addf %49, %55 : vector<64x128xf32>
    %c0_52 = arith.constant 0 : index
    %c1_53 = arith.constant 1 : index
    %c1_54 = arith.constant 1 : index
    %c0_55 = arith.constant 0 : index
    %57 = vector.load %arg1[%c0_52, %c1_53, %c1_54, %c0_55] : memref<1x36x9x8xf32, #tpu.memory_space<vmem>>, vector<1x8x8x8xf32>
    %58 = vector.shape_cast %57 : vector<1x8x8x8xf32> to vector<8x8x8xf32>
    %59 = vector.shape_cast %58 : vector<8x8x8xf32> to vector<64x8xf32>
    %c8 = arith.constant 8 : index
    %c0_56 = arith.constant 0 : index
    %c0_57 = arith.constant 0 : index
    %60 = vector.load %arg2[%c8, %c0_56, %c0_57] : memref<9x8x128xf32, #tpu.memory_space<vmem>>, vector<1x8x128xf32>
    %61 = vector.shape_cast %60 : vector<1x8x128xf32> to vector<8x128xf32>
    %cst_58 = arith.constant dense<0.000000e+00> : vector<64x128xf32>
    %62 = tpu.matmul %59, %61, %cst_58 {dimension_numbers = #tpu.dot_dimension_numbers<[1], [0], [0], [1], [0, 0, 1, 1], [], []>} : vector<64x8xf32>, vector<8x128xf32>, vector<64x128xf32> -> vector<64x128xf32>
    %63 = arith.addf %56, %62 : vector<64x128xf32>
    %c0_59 = arith.constant 0 : index
    %c0_60 = arith.constant 0 : index
    %c0_61 = arith.constant 0 : index
    %64 = vector.load %arg3[%c0_59, %c0_60, %c0_61] : memref<1x64x128xf32, #tpu.memory_space<vmem>>, vector<1x64x128xf32>
    %65 = vector.shape_cast %64 : vector<1x64x128xf32> to vector<64x128xf32>
    %66 = vector.shape_cast %63 : vector<64x128xf32> to vector<1x64x128xf32>
    tpu.vector_store %arg3[%c0_59, %c0_60, %c0_61], %66 {strides = array<i32>} : memref<1x64x128xf32, #tpu.memory_space<vmem>>, vector<1x64x128xf32>,
    %cst_62 = arith.constant dense<0.000000e+00> : vector<128xf32>
    %67 = vector.multi_reduction <add>, %63, %cst_62 [0] : vector<64x128xf32> to vector<128xf32>
    %68 = vector.shape_cast %67 : vector<128xf32> to vector<1x128xf32>
    %c0_63 = arith.constant 0 : index
    %c0_64 = arith.constant 0 : index
    %c0_65 = arith.constant 0 : index
    %69 = vector.load %arg4[%c0_63, %c0_64, %c0_65] : memref<1x1x128xf32, #tpu.memory_space<vmem>>, vector<1x1x128xf32>
    %70 = vector.shape_cast %69 : vector<1x1x128xf32> to vector<1x128xf32>
    %71 = vector.shape_cast %68 : vector<1x128xf32> to vector<1x1x128xf32>
    tpu.vector_store %arg4[%c0_63, %c0_64, %c0_65], %71 {strides = array<i32>} : memref<1x1x128xf32, #tpu.memory_space<vmem>>, vector<1x1x128xf32>,
    %72 = arith.mulf %63, %63 : vector<64x128xf32>
    %cst_66 = arith.constant dense<0.000000e+00> : vector<128xf32>
    %73 = vector.multi_reduction <add>, %72, %cst_66 [0] : vector<64x128xf32> to vector<128xf32>
    %74 = vector.shape_cast %73 : vector<128xf32> to vector<1x128xf32>
    %c0_67 = arith.constant 0 : index
    %c0_68 = arith.constant 0 : index
    %c0_69 = arith.constant 0 : index
    %75 = vector.load %arg5[%c0_67, %c0_68, %c0_69] : memref<1x1x128xf32, #tpu.memory_space<vmem>>, vector<1x1x128xf32>
    %76 = vector.shape_cast %75 : vector<1x1x128xf32> to vector<1x128xf32>
    %77 = vector.shape_cast %74 : vector<1x128xf32> to vector<1x1x128xf32>
    tpu.vector_store %arg5[%c0_67, %c0_68, %c0_69], %77 {strides = array<i32>} : memref<1x1x128xf32, #tpu.memory_space<vmem>>, vector<1x1x128xf32>,
    return
  }
  func.func @transform_0(%arg0: i32) -> (i32, i32, i32, i32) {
    %c0_i32 = arith.constant 0 : i32
    %c0_i32_0 = arith.constant 0 : i32
    %c0_i32_1 = arith.constant 0 : i32
    %c0_i32_2 = arith.constant 0 : i32
    return %arg0, %c0_i32, %c0_i32_0, %c0_i32_1 : i32, i32, i32, i32
  }
  func.func @transform_1(%arg0: i32) -> (i32, i32, i32) {
    %c0_i32 = arith.constant 0 : i32
    %c0_i32_0 = arith.constant 0 : i32
    %c0_i32_1 = arith.constant 0 : i32
    %c0_i32_2 = arith.constant 0 : i32
    return %c0_i32, %c0_i32_0, %c0_i32_1 : i32, i32, i32
  }
  func.func @transform_2(%arg0: i32) -> (i32, i32, i32) {
    %c0_i32 = arith.constant 0 : i32
    %c0_i32_0 = arith.constant 0 : i32
    %c0_i32_1 = arith.constant 0 : i32
    return %arg0, %c0_i32, %c0_i32_0 : i32, i32, i32
  }
  func.func @transform_3(%arg0: i32) -> (i32, i32, i32) {
    %c0_i32 = arith.constant 0 : i32
    %c0_i32_0 = arith.constant 0 : i32
    %c0_i32_1 = arith.constant 0 : i32
    return %arg0, %c0_i32, %c0_i32_0 : i32, i32, i32
  }
  func.func @transform_4(%arg0: i32) -> (i32, i32, i32) {
    %c0_i32 = arith.constant 0 : i32
    %c0_i32_0 = arith.constant 0 : i32
    %c0_i32_1 = arith.constant 0 : i32
    return %arg0, %c0_i32, %c0_i32_0 : i32, i32, i32
  }
}

</mosaic_0001>

<bundles_post_ra>
// kernel: tpu_custom_call.1
= control target key start
LH: loop header
LB: loop body
LE: loop exit
PB: predicated region body
PF: predicated region fallthrough
CT: control target
= control target key end

     0   :  { %10 = vsyncpa [#allocation3], 0  ;;  %s2735_s0 = inlined_call_operand.vmem [shape: f32[2,36,9,8], index: 0, kind: input, shape index: {}]   ;;  %s2736_s1 = inlined_call_operand.vmem [shape: f32[9,8,128], index: 1, kind: input, shape index: {}]   ;;  %s2737_s2 = inlined_call_operand.hbm [shape: f32[2,64,128], index: 2, kind: output, shape index: {0}]   ;;  %s2738_s3 = inlined_call_operand.hbm [shape: f32[2,1,128], index: 3, kind: output, shape index: {1}]   ;;  %s2739_s4 = inlined_call_operand.hbm [shape: f32[2,1,128], index: 4, kind: output, shape index: {2}]  }
   0x1   :  { %12 = vsyncpa [#allocation3 + $0x1], 0 }
   0x2   :  { %13 = vsyncpa [#allocation5], 0 }
   0x3   :  { %15 = vsyncpa [#allocation5 + $0x1], 0  ;;  %s2360_s15 = smov 0   ;;  %s2362_s16 = smov 0  }
   0x4   :  { %s2364_s17 = smov 0   ;;  %s2366_s18 = smov 0  }
   0x5 LB: > { %s2381_s19 = sadd.s32 4294967295, %s2328_s18   ;;  %s1731_s20 = sadd.s32 4294967294, %s2328_s18   ;;  %s2328_s18 = sphi %s2366_s18, %s2745_s18   ;;  %s2324_s17 = sphi %s2364_s17, %s2744_s17   ;;  %s2320_s16 = sphi %s2362_s16, %s2743_s16   ;;  %s2316_s15 = sphi %s2360_s15, %s2742_s15  }
   0x6   : > { %s2385_s21 = sadd.s32 1, %s2328_s18   ;;  %s75_s22 = sadd.s32 1, %s2324_s17 }
   0x7   : > { %s72_s23 = ssub.s32 %s2328_s18, %s2385_s21  ;;  %p85_p0 = scmp.ne.s32.totalorder %s2324_s17, %s2320_s16 }
   0x8   : > { %p73_p1 = scmp.eq.s32.totalorder %s72_s23, 0  ;;  %p86_p2 = scmp.eq.s32.totalorder %s2381_s19, 1 }
   0x9   : > { %p91_p3 = scmp.ne.s32.totalorder %s2320_s16, %s2316_s15  ;;  %p92_p4 = scmp.eq.s32.totalorder %s1731_s20, 1 }
   0xa   : > { %s2398_s24 = scalar_select %p73_p1, %s2324_s17, %s75_s22  }
   0xb   : > { %p2400_p5 = por %p86_p2, %p85_p0  ;;  %p2404_p6 = por %p92_p4, %p91_p3 }
   0xc   : > { %p1734_p7 = scmp.ge.s32.totalorder %s2328_s18, 1  ;;  %p173_p8 = scmp.lt.s32.totalorder %s2328_s18, 3 }
   0xe   : > { %p174_p9 = pnand %p1734_p7, %p173_p8 }
   0xf   : > { %v1745_v0 = vld [vmem:[%s2736_s1 + $0x8] sm:$0xff] (!%p174_p9)  ;;  %v2416_v1 = vld [vmem:[%s2736_s1 + $0x20] sm:$0xff] (!%p174_p9)  ;;  %p207_p10 = scmp.lt.s32.totalorder (!%p174_p9), %s2381_s19, 1  ;;  %vm232_vm0 = vcmask (!%p174_p9), 64512   ;;  %v1830_v10 = vld [vmem:[%s2736_s1 + $0x30] sm:$0xff] (!%p174_p9)  ;;  %s2602_s8 = sand.u32 (!%p174_p9), 1, %s2320_s16  }
  0x10   : > { %177 = sbr.rel (%p174_p9) target bundleno = 378 (0x17a), region = 28  ;;  %v220_v2 = vld [vmem:[%s2736_s1] sm:$0xff] (!%p174_p9)  ;;  %1962 = vmatprep.subr.mxu1 (!%p174_p9), %v1745_v0  ;;  %2018 = vmatprep.subr.mxu0 (!%p174_p9), %v2416_v1  ;;  %v1813_v3 = vld [vmem:[%s2736_s1 + $0x28] sm:$0xff] (!%p174_p9)  ;;  %v1762_v11 = vld [vmem:[%s2736_s1 + $0x10] sm:$0xff] (!%p174_p9)  ;;  %s1880_s11 = sshll.u32 (!%p174_p9), %s2381_s19, 10 }
  0x11   : > { %1963 = vmatpush3.msra.mxu1 (!%p174_p9), %v1745_v0  ;;  %2019 = vmatpush3.msra.mxu0 (!%p174_p9), %v2416_v1  ;;  %v1847_v20 = vld [vmem:[%s2736_s1 + $0x38] sm:$0xff] (!%p174_p9)  ;;  %v1864_v35 = vld [vmem:[%s2736_s1 + $0x40] sm:$0xff] (!%p174_p9)  ;;  %s2618_s22 = scalar_lea.hbm (!%p174_p9), %s2737_s2, %s1880_s11  ;;  %s1569_s23 = scalar_lea.sflag (!%p174_p9), [#allocation3], %s2602_s8 }
  0x12   : > { %1976 = vmatprep.subr.mxu1 (!%p174_p9), %v220_v2  ;;  %2032 = vmatprep.subr.mxu0 (!%p174_p9), %v1813_v3  ;;  %v1779_v29 = vld [vmem:[%s2736_s1 + $0x18] sm:$0xff] (!%p174_p9)  ;;  %s2330_s28 = smov (!%p174_p9), [#allocation2]  }
  0x13   : > { %s2210_s29 = sshll.u32 (!%p174_p9), %s2330_s28, 4  ;;  %s2211_s29 = int_to_ptr.vmem [resolvable:$false] %s2210_s29 }
  0x14   : > { %s2212_s30 = scalar_lea.vmem (!%p174_p9), %s2211_s29, 2048 }
  0x17   : > { %s208_s9 = scalar_select %p207_p10, %s2381_s19, 1 }
  0x19   : > { %s2154_s10 = smul.u32 576, %s208_s9  ;;  %s1735_s9 = sshll.u32 %s2602_s8, 6 }
  0x1b   : > { %s2431_s13 = scalar_lea.vmem %s2735_s0, %s2154_s10  ;;  %s2605_s10 = scalar_lea.vmem [#allocation2], %s1735_s9 }
  0x1c   : > { %v1737_v4 = vld [vmem:[%s2431_s13 + $0x90] sm:$0xff]  ;;  %v2436_v6 = vld [vmem:[%s2431_s13 + $0xa0] sm:$0xff]  ;;  %s1590_s12 = sshll.u32 %s2605_s10, 4  ;;  %s2620_s12 = int_to_ptr.vmem [resolvable:$true] %s1590_s12 }
  0x1d   : > { %v1788_v5 = vld [vmem:[%s2431_s13 + $0x1b0] sm:$0xff]  ;;  %1964 = vmatprep.mubr.msk.f32.mxu1 %vm232_vm0, %v1737_v4  ;;  %v1789_v7 = vld [vmem:[%s2431_s13 + $0x1c0] sm:$0xff]  ;;  %s2206_s27 = scalar_lea.vmem %s2620_s12, 1024  ;;  %p2213_p0 = scmp.lt.s32.totalorder %s2620_s12, %s2211_s29 }
  0x1e   : > { %2020 = vmatprep.mubr.msk.f32.mxu0 %vm232_vm0, %v1788_v5  ;;  %v2442_v8 = vld [vmem:[%s2431_s13 + $0xb0] sm:$0xff]  ;;  %1965 = vmatmul.mubr.msk.f32.vlgmr.msra.gmra.mrb[0].mxu1 %vm232_vm0, %v2436_v6  ;;  %v2455_v12 = vld [vmem:[%s2431_s13 + $0xc0] sm:$0xff]  ;;  %p2207_p11 = scmp.ne.s32.totalorder %s2620_s12, %s2206_s27  ;;  %p2214_p1 = scmp.lt.s32.totalorder %s2212_s30, %s2206_s27 }
  0x1f   : > { %v1790_v9 = vld [vmem:[%s2431_s13 + $0x1d0] sm:$0xff]  ;;  %2021 = vmatmul.mubr.msk.f32.vlgmr.msra.gmra.mrb[0].mxu0 %vm232_vm0, %v1789_v7  ;;  %1977 = vmatpush3.msra.mxu1 %v220_v2  ;;  %v1791_v13 = vld [vmem:[%s2431_s13 + $0x1e0] sm:$0xff] }
  0x20   : > { %2033 = vmatpush3.msra.mxu0 %v1813_v3  ;;  %1967 = vmatprep.mubr.msk.f32.mxu1 %vm232_vm0, %v2442_v8  ;;  %v2462_v14 = vld [vmem:[%s2431_s13 + $0xd0] sm:$0xff]  ;;  %v1805_v15 = vld [vmem:[%s2431_s13 + $0x121] sm:$0xff]  ;;  %p2208_p12 = pnand %p2207_p11, %p2400_p5  ;;  %p2215_p2 = por %p2214_p1, %p2213_p0 }
  0x21   : > { %2023 = vmatprep.mubr.msk.f32.mxu0 %vm232_vm0, %v1790_v9  ;;  %2046 = vmatprep.subr.mxu0 %v1830_v10  ;;  %v2472_v16 = vld [vmem:[%s2431_s13 + $0xe0] sm:$0xff]  ;;  %v1806_v17 = vld [vmem:[%s2431_s13 + $0x131] sm:$0xff] }
  0x22   : > { %1990 = vmatprep.subr.mxu1 %v1762_v11  ;;  %1968 = vmatmul.mubr.msk.f32.gmra.mrb[2].mxu1 %vm232_vm0, %v2455_v12  ;;  %v2476_v18 = vld [vmem:[%s2431_s13 + $0xf0] sm:$0xff]  ;;  %v1807_v19 = vld [vmem:[%s2431_s13 + $0x141] sm:$0xff]  ;;  %p2209_p13 = pneg %p2208_p12 }
  0x23   : > { %2024 = vmatmul.mubr.msk.f32.gmra.mrb[2].mxu0 %vm232_vm0, %v1791_v13  ;;  %1970 = vmatprep.mubr.msk.f32.mxu1 %vm232_vm0, %v2462_v14  ;;  %v2488_v21 = vld [vmem:[%s2431_s13 + $0x100] sm:$0xff]  ;;  %v1808_v22 = vld [vmem:[%s2431_s13 + $0x151] sm:$0xff] }
  0x24   : > { %2034 = vmatprep.mubr.msk.f32.mxu0 %vm232_vm0, %v1805_v15  ;;  %v212_v23 = vld [vmem:[%s2431_s13] sm:$0xff]  ;;  %v213_v25 = vld [vmem:[%s2431_s13 + $0x10] sm:$0xff]  ;;  %p2216_p3 = pnand %p2215_p2, %p2209_p13 }
  0x25   : > { %v1809_v24 = vld [vmem:[%s2431_s13 + $0x161] sm:$0xff]  ;;  %v1810_v26 = vld [vmem:[%s2431_s13 + $0x171] sm:$0xff] }
  0x26   : > { %1971 = vmatmul.mubr.msk.f32.gmra.mrb[4].mxu1 %vm232_vm0, %v2472_v16  ;;  %v214_v27 = vld [vmem:[%s2431_s13 + $0x20] sm:$0xff]  ;;  %v215_v30 = vld [vmem:[%s2431_s13 + $0x30] sm:$0xff] }
  0x27   : > { %2035 = vmatmul.mubr.msk.f32.vlgmr.msra.gmra.mrb[0].mxu0 %vm232_vm0, %v1806_v17  ;;  %1973 = vmatprep.mubr.msk.f32.mxu1 %vm232_vm0, %v2476_v18  ;;  %v1811_v28 = vld [vmem:[%s2431_s13 + $0x181] sm:$0xff]  ;;  %v1812_v31 = vld [vmem:[%s2431_s13 + $0x191] sm:$0xff] }
  0x28   : > { %2047 = vmatpush3.msra.mxu0 %v1830_v10  ;;  %2037 = vmatprep.mubr.msk.f32.mxu0 %vm232_vm0, %v1807_v19  ;;  %v216_v32 = vld [vmem:[%s2431_s13 + $0x40] sm:$0xff]  ;;  %v217_v33 = vld [vmem:[%s2431_s13 + $0x50] sm:$0xff] }
  0x29   : > { %2060 = vmatprep.subr.mxu0 %v1847_v20  ;;  %v218_v34 = vld [vmem:[%s2431_s13 + $0x60] sm:$0xff]  ;;  %v219_v36 = vld [vmem:[%s2431_s13 + $0x70] sm:$0xff] }
  0x2a   : > { %1974 = vmatmul.mubr.msk.f32.gmra.mrb[6].mxu1 %vm232_vm0, %v2488_v21  ;;  %v491_v37 = vld [vmem:[%s2431_s13 + $0x1] sm:$0xff]  ;;  %v492_v38 = vld [vmem:[%s2431_s13 + $0x11] sm:$0xff] }
  0x2b   : > { %2038 = vmatmul.mubr.msk.f32.gmra.mrb[2].mxu0 %vm232_vm0, %v1808_v22  ;;  %1978 = vmatprep.mubr.msk.f32.mxu1 %vm232_vm0, %v212_v23  ;;  %v493_v39 = vld [vmem:[%s2431_s13 + $0x21] sm:$0xff]  ;;  %v494_v40 = vld [vmem:[%s2431_s13 + $0x31] sm:$0xff] }
  0x2c   : > { %2040 = vmatprep.mubr.msk.f32.mxu0 %vm232_vm0, %v1809_v24  ;;  %v1829_v41 = vld [vmem:[%s2431_s13 + $0x80] sm:$0xff]  ;;  %v496_v43 = vld [vmem:[%s2431_s13 + $0x51] sm:$0xff] }
  0x2d   : > { %v495_v42 = vld [vmem:[%s2431_s13 + $0x41] sm:$0xff]  ;;  %v498_v45 = vld [vmem:[%s2431_s13 + $0x71] sm:$0xff] }
  0x2e   : > { %1979 = vmatmul.mubr.msk.f32.vlgmr.msra.gmra.mrb[0].mxu1 %vm232_vm0, %v213_v25  ;;  %v497_v44 = vld [vmem:[%s2431_s13 + $0x61] sm:$0xff]  ;;  %v1772_v47 = vld [vmem:[%s2431_s13 + $0x130] sm:$0xff] }
  0x2f   : > { %2041 = vmatmul.mubr.msk.f32.gmra.mrb[4].mxu0 %vm232_vm0, %v1810_v26  ;;  %1991 = vmatpush3.msra.mxu1 %v1762_v11  ;;  %v1771_v46 = vld [vmem:[%s2431_s13 + $0x120] sm:$0xff]  ;;  %v1774_v49 = vld [vmem:[%s2431_s13 + $0x150] sm:$0xff] }
  0x30   : > { %1981 = vmatprep.mubr.msk.f32.mxu1 %vm232_vm0, %v214_v27  ;;  %2043 = vmatprep.mubr.msk.f32.mxu0 %vm232_vm0, %v1811_v28  ;;  %v1773_v48 = vld [vmem:[%s2431_s13 + $0x140] sm:$0xff]  ;;  %v1846_v50 = vld [vmem:[%s2431_s13 + $0x110] sm:$0xff] }
  0x31   : > { %2004 = vmatprep.subr.mxu1 %v1779_v29  ;;  %v1775_v51 = vld [vmem:[%s2431_s13 + $0x160] sm:$0xff]  ;;  %v1776_v52 = vld [vmem:[%s2431_s13 + $0x170] sm:$0xff] }
  0x32   : > { %1982 = vmatmul.mubr.msk.f32.gmra.mrb[2].mxu1 %vm232_vm0, %v215_v30  ;;  %v1777_v53 = vld [vmem:[%s2431_s13 + $0x180] sm:$0xff]  ;;  %v1778_v54 = vld [vmem:[%s2431_s13 + $0x190] sm:$0xff] }
  0x33   : > { %2044 = vmatmul.mubr.msk.f32.gmra.mrb[6].mxu0 %vm232_vm0, %v1812_v31  ;;  %1984 = vmatprep.mubr.msk.f32.mxu1 %vm232_vm0, %v216_v32  ;;  %v1792_v55 = vld [vmem:[%s2431_s13 + $0x1f0] sm:$0xff]  ;;  %v1793_v56 = vld [vmem:[%s2431_s13 + $0x200] sm:$0xff] }
  0x34   : > { %2048 = vmatprep.mubr.msk.f32.mxu0 %vm232_vm0, %v213_v25  ;;  %v1794_v57 = vld [vmem:[%s2431_s13 + $0x210] sm:$0xff]  ;;  %v1795_v58 = vld [vmem:[%s2431_s13 + $0x220] sm:$0xff] }
  0x35   : > { %v1863_v59 = vld [vmem:[%s2431_s13 + $0x81] sm:$0xff] }
  0x36   : > { %1985 = vmatmul.mubr.msk.f32.gmra.mrb[4].mxu1 %vm232_vm0, %v217_v33 }
  0x37   : > { %2049 = vmatmul.mubr.msk.f32.vlgmr.msra.gmra.mrb[0].mxu0 %vm232_vm0, %v214_v27  ;;  %1987 = vmatprep.mubr.msk.f32.mxu1 %vm232_vm0, %v218_v34 }
  0x38   : > { %2061 = vmatpush3.msra.mxu0 %v1847_v20  ;;  %2051 = vmatprep.mubr.msk.f32.mxu0 %vm232_vm0, %v215_v30 }
  0x39   : > { %2074 = vmatprep.subr.mxu0 %v1864_v35 }
  0x3a   : > { %1988 = vmatmul.mubr.msk.f32.gmra.mrb[6].mxu1 %vm232_vm0, %v219_v36 }
  0x3b   : > { %2052 = vmatmul.mubr.msk.f32.gmra.mrb[2].mxu0 %vm232_vm0, %v216_v32  ;;  %1992 = vmatprep.mubr.msk.f32.mxu1 %vm232_vm0, %v491_v37 }
  0x3c   : > { %2054 = vmatprep.mubr.msk.f32.mxu0 %vm232_vm0, %v217_v33 }
  0x3e   : > { %1993 = vmatmul.mubr.msk.f32.vlgmr.msra.gmra.mrb[0].mxu1 %vm232_vm0, %v492_v38 }
  0x3f   : > { %2055 = vmatmul.mubr.msk.f32.gmra.mrb[4].mxu0 %vm232_vm0, %v218_v34  ;;  %2005 = vmatpush3.msra.mxu1 %v1779_v29 }
  0x40   : > { %1995 = vmatprep.mubr.msk.f32.mxu1 %vm232_vm0, %v493_v39  ;;  %2057 = vmatprep.mubr.msk.f32.mxu0 %vm232_vm0, %v219_v36 }
  0x41   : > { %2088 = vmatprep.subr.mxu1 %v2416_v1 }
  0x42   : > { %1996 = vmatmul.mubr.msk.f32.gmra.mrb[2].mxu1 %vm232_vm0, %v494_v40 }
  0x43   : > { %2058 = vmatmul.mubr.msk.f32.gmra.mrb[6].mxu0 %vm232_vm0, %v1829_v41  ;;  %1998 = vmatprep.mubr.msk.f32.mxu1 %vm232_vm0, %v495_v42 }
  0x44   : > { %2062 = vmatprep.mubr.msk.f32.mxu0 %vm232_vm0, %v2436_v6 }
  0x46   : > { %1999 = vmatmul.mubr.msk.f32.gmra.mrb[4].mxu1 %vm232_vm0, %v496_v43 }
  0x47   : > { %2063 = vmatmul.mubr.msk.f32.vlgmr.msra.gmra.mrb[0].mxu0 %vm232_vm0, %v2442_v8  ;;  %2001 = vmatprep.mubr.msk.f32.mxu1 %vm232_vm0, %v497_v44 }
  0x48   : > { %2075 = vmatpush3.msra.mxu0 %v1864_v35  ;;  %2065 = vmatprep.mubr.msk.f32.mxu0 %vm232_vm0, %v2455_v12 }
  0x4a   : > { %2002 = vmatmul.mubr.msk.f32.gmra.mrb[6].mxu1 %vm232_vm0, %v498_v45 }
  0x4b   : > { %2066 = vmatmul.mubr.msk.f32.gmra.mrb[2].mxu0 %vm232_vm0, %v2462_v14  ;;  %2006 = vmatprep.mubr.msk.f32.mxu1 %vm232_vm0, %v1771_v46 }
  0x4c   : > { %2068 = vmatprep.mubr.msk.f32.mxu0 %vm232_vm0, %v2472_v16 }
  0x4e   : > { %2007 = vmatmul.mubr.msk.f32.vlgmr.msra.gmra.mrb[0].mxu1 %vm232_vm0, %v1772_v47 }
  0x4f   : > { %2069 = vmatmul.mubr.msk.f32.gmra.mrb[4].mxu0 %vm232_vm0, %v2476_v18  ;;  %2089 = vmatpush3.msra.mxu1 %v2416_v1 }
  0x50   : > { %2009 = vmatprep.mubr.msk.f32.mxu1 %vm232_vm0, %v1773_v48  ;;  %2071 = vmatprep.mubr.msk.f32.mxu0 %vm232_vm0, %v2488_v21 }
  0x52   : > { %2010 = vmatmul.mubr.msk.f32.gmra.mrb[2].mxu1 %vm232_vm0, %v1774_v49 }
  0x53   : > { %2072 = vmatmul.mubr.msk.f32.gmra.mrb[6].mxu0 %vm232_vm0, %v1846_v50  ;;  %2012 = vmatprep.mubr.msk.f32.mxu1 %vm232_vm0, %v1775_v51 }
  0x54   : > { %2076 = vmatprep.mubr.msk.f32.mxu0 %vm232_vm0, %v492_v38 }
  0x56   : > { %2013 = vmatmul.mubr.msk.f32.gmra.mrb[4].mxu1 %vm232_vm0, %v1776_v52 }
  0x57   : > { %2077 = vmatmul.mubr.msk.f32.vlgmr.msra.gmra.mrb[0].mxu0 %vm232_vm0, %v493_v39  ;;  %2015 = vmatprep.mubr.msk.f32.mxu1 %vm232_vm0, %v1777_v53 }
  0x58   : > { %2079 = vmatprep.mubr.msk.f32.mxu0 %vm232_vm0, %v494_v40 }
  0x5a   : > { %2016 = vmatmul.mubr.msk.f32.gmra.mrb[6].mxu1 %vm232_vm0, %v1778_v54 }
  0x5b   : > { %2080 = vmatmul.mubr.msk.f32.gmra.mrb[2].mxu0 %vm232_vm0, %v495_v42  ;;  %2026 = vmatprep.mubr.msk.f32.mxu1 %vm232_vm0, %v1792_v55 }
  0x5c   : > { %2082 = vmatprep.mubr.msk.f32.mxu0 %vm232_vm0, %v496_v43 }
  0x5e   : > { %2027 = vmatmul.mubr.msk.f32.vlgmr.msra.gmra.mrb[4].mxu1 %vm232_vm0, %v1793_v56 }
  0x5f   : > { %2083 = vmatmul.mubr.msk.f32.gmra.mrb[4].mxu0 %vm232_vm0, %v497_v44  ;;  %2029 = vmatprep.mubr.msk.f32.mxu1 %vm232_vm0, %v1794_v57 }
  0x60   : > { %2085 = vmatprep.mubr.msk.f32.mxu0 %vm232_vm0, %v498_v45 }
  0x62   : > { %2030 = vmatmul.mubr.msk.f32.gmra.mrb[6].mxu1 %vm232_vm0, %v1795_v58 }
  0x63   : > { %2086 = vmatmul.mubr.msk.f32.gmra.mrb[6].mxu0 %vm232_vm0, %v1863_v59 }
 0x121   : > { %v2008_v60 = vpop.f32.mrb[0].mxu1 }
 0x122   : > { %v739_v61 = vpop.f32.mrb[1].mxu1 }
 0x125   : > { %v2011_v62 = vpop.f32.mrb[2].mxu1 }
 0x126   : > { %v749_v63 = vpop.f32.mrb[3].mxu1 }
 0x12a   : > { %v2078_v0 = vpop.f32.mrb[0].mxu0 }
 0x12b   : > { %v2090_v1 = vadd.f32 %v2078_v0, %v2008_v60  ;;  %v1477_v2 = vpop.f32.mrb[1].mxu0 }
 0x12c   : > { %v2091_v3 = vadd.f32 %v1477_v2, %v739_v61 }
 0x12d   : > { %1525 = vst [vmem:[%s2605_s10 + $0x8] sm:$0xff] %v2090_v1  ;;  %v1547_v4 = vmul.f32 %v2090_v1, %v2090_v1 }
 0x12e   : > { %1524 = vst [vmem:[%s2605_s10] sm:$0xff] %v2091_v3  ;;  %v1532_v5 = vadd.f32 %v2091_v3, %v2090_v1  ;;  %v1546_v6 = vmul.f32 %v2091_v3, %v2091_v3  ;;  %v2081_v7 = vpop.f32.mrb[2].mxu0 }
 0x12f   : > { %v2092_v8 = vadd.f32 %v2081_v7, %v2011_v62  ;;  %v1487_v9 = vpop.f32.mrb[3].mxu0 }
 0x130   : > { %v1554_v10 = vadd.f32 %v1547_v4, %v1546_v6  ;;  %v2093_v11 = vadd.f32 %v1487_v9, %v749_v63 }
 0x131   : > { %1527 = vst [vmem:[%s2605_s10 + $0x18] sm:$0xff] %v2092_v8  ;;  %v2028_v14 = vpop.f32.mrb[4].mxu1  ;;  %v1549_v19 = vmul.f32 %v2092_v8, %v2092_v8 }
 0x132   : > { %1526 = vst [vmem:[%s2605_s10 + $0x10] sm:$0xff] %v2093_v11  ;;  %v1533_v12 = vadd.f32 %v2093_v11, %v1532_v5  ;;  %v1548_v13 = vmul.f32 %v2093_v11, %v2093_v11  ;;  %v2084_v15 = vpop.f32.mrb[4].mxu0  ;;  %v907_v17 = vpop.f32.mrb[5].mxu1 }
 0x133   : > { %v2094_v16 = vadd.f32 %v2084_v15, %v2028_v14  ;;  %v1497_v18 = vpop.f32.mrb[5].mxu0 }
 0x134   : > { %v1555_v20 = vadd.f32 %v1554_v10, %v1548_v13  ;;  %v2095_v21 = vadd.f32 %v1497_v18, %v907_v17  ;;  %v1534_v22 = vadd.f32 %v2092_v8, %v1533_v12 }
 0x135   : > { %1529 = vst [vmem:[%s2605_s10 + $0x28] sm:$0xff] %v2094_v16  ;;  %v2031_v26 = vpop.f32.mrb[6].mxu1  ;;  %v1551_v31 = vmul.f32 %v2094_v16, %v2094_v16 }
 0x136   : > { %1528 = vst [vmem:[%s2605_s10 + $0x20] sm:$0xff] %v2095_v21  ;;  %v1535_v23 = vadd.f32 %v2095_v21, %v1534_v22  ;;  %v1550_v24 = vmul.f32 %v2095_v21, %v2095_v21  ;;  %v1556_v25 = vadd.f32 %v1555_v20, %v1549_v19  ;;  %v2087_v27 = vpop.f32.mrb[6].mxu0  ;;  %v917_v29 = vpop.f32.mrb[7].mxu1 }
 0x137   : > { %v2096_v28 = vadd.f32 %v2087_v27, %v2031_v26  ;;  %v1507_v30 = vpop.f32.mrb[7].mxu0 }
 0x138   : > { %v1557_v32 = vadd.f32 %v1556_v25, %v1550_v24  ;;  %v2097_v33 = vadd.f32 %v1507_v30, %v917_v29  ;;  %v1536_v34 = vadd.f32 %v2094_v16, %v1535_v23 }
 0x139   : > { %1531 = vst [vmem:[%s2605_s10 + $0x38] sm:$0xff] %v2096_v28 }
 0x13a   : > { %1530 = vst [vmem:[%s2605_s10 + $0x30] sm:$0xff] %v2097_v33  ;;  %v1537_v35 = vadd.f32 %v2097_v33, %v1536_v34  ;;  %v1552_v36 = vmul.f32 %v2097_v33, %v2097_v33  ;;  %v1558_v37 = vadd.f32 %v1557_v32, %v1551_v31 }
 0x13b   : > { %2219 = shalt.err (!%p2216_p3)
}
 0x13c   : > { %s2220_s5 = scalar_lea.hbm %s2618_s22, 1024  ;;  %s2224_s9 = scalar_lea.hbm %s2737_s2, 2048 }
 0x13d   : > { %p2221_p4 = scmp.ne.s32.totalorder %s2618_s22, %s2220_s5  ;;  %p2225_p9 = scmp.lt.u32.totalorder %s2618_s22, %s2737_s2 }
 0x13e   : > { %p2226_p10 = scmp.lt.u32.totalorder %s2224_s9, %s2220_s5  ;;  %p2228_p12 = scmp.lt.u32.totalorder %s2220_s5, %s2618_s22 }
 0x13f   : > { %p2222_p7 = pnand %p2221_p4, %p2400_p5 }
 0x140   : > { %p2227_p11 = por %p2226_p10, %p2225_p9 }
 0x141   : > { %p2223_p8 = pneg %p2222_p7 }
 0x142   : > { %p2229_p13 = por %p2228_p12, %p2227_p11 }
 0x144   : > { %p2230_p0 = pnand %p2229_p13, %p2223_p8 }
 0x146   : > { %2233 = shalt.err (!%p2230_p0)
}
 0x147   : > { %s2331_s13 = smov 128   ;;  %s2332_s14 = smov 8   ;;  %v1553_v38 = vmul.f32 %v2096_v28, %v2096_v28  ;;  %v1538_v39 = vadd.f32 %v2096_v28, %v1537_v35  ;;  %v1559_v40 = vadd.f32 %v1558_v37, %v1552_v36 }
 0x148   : > { %2155 = dma.vmem_to_hbm [thread:$0]  (%p2400_p5), %s2620_s12, 1024, %s2618_s22, %s1569_s23, %s2331_s13, %s2331_s13, %s2332_s14  }
 0x149   : > { %v1539_v41 = vrot.slane %v1538_v39, 4  ;;  %v1560_v42 = vadd.f32 %v1559_v40, %v1553_v38  ;;  %s1573_s27 = sand.u32 1, %s2381_s19   ;;  %s1876_s28 = sshll.u32 %s2381_s19, 4 }
 0x14a   : > { %s200_s29 = scalar_lea.vmem [#allocation4], %s2602_s8  ;;  %s206_s12 = scalar_lea.vmem [#allocation6], %s2602_s8 }
 0x14b   : > { %v1540_v43 = vadd.f32 %v1539_v41, %v1538_v39  ;;  %v1561_v44 = vrot.slane %v1560_v42, 4  ;;  %s1606_s30 = sshll.u32 %s200_s29, 4  ;;  %s1619_s22 = sshll.u32 %s206_s12, 4  ;;  %s2659_s30 = int_to_ptr.vmem [resolvable:$true] %s1606_s30  ;;  %s2666_s22 = int_to_ptr.vmem [resolvable:$true] %s1619_s22 }
 0x14c   : > { %s2657_s6 = scalar_lea.hbm %s2738_s3, %s1876_s28  ;;  %s2664_s9 = scalar_lea.hbm %s2739_s4, %s1876_s28 }
 0x14d   : > { %v1562_v45 = vadd.f32 %v1561_v44, %v1560_v42  ;;  %v1541_v46 = vrot.slane %v1540_v43, 2  ;;  %s2668_s10 = scalar_lea.sflag [#allocation5], %s1573_s27  ;;  %s2234_s11 = scalar_lea.vmem %s2659_s30, 16 }
 0x14e   : > { %p2235_p1 = scmp.ne.s32.totalorder %s2659_s30, %s2234_s11  ;;  %s2333_s13 = smov [#allocation4]  }
 0x14f   : > { %v1542_v47 = vadd.f32 %v1541_v46, %v1540_v43  ;;  %v1563_v48 = vrot.slane %v1562_v45, 2  ;;  %s2238_s14 = sshll.u32 %s2333_s13, 4  ;;  %s2239_s14 = int_to_ptr.vmem [resolvable:$false] %s2238_s14 }
 0x150   : > { %p2236_p2 = pnand %p2235_p1, %p2400_p5  ;;  %s2240_s23 = scalar_lea.vmem %s2239_s14, 32 }
 0x151   : > { %v1543_v49 = vrot.slane %v1542_v47, 1  ;;  %v1564_v50 = vadd.f32 %v1563_v48, %v1562_v45  ;;  %p2241_p4 = scmp.lt.s32.totalorder %s2659_s30, %s2239_s14  ;;  %p2242_p7 = scmp.lt.s32.totalorder %s2240_s23, %s2234_s11 }
 0x152   : > { %p2237_p3 = pneg %p2236_p2 }
 0x153   : > { %v1544_v51 = vadd.f32 %v1543_v49, %v1542_v47  ;;  %v1565_v52 = vrot.slane %v1564_v50, 1  ;;  %p2243_p8 = por %p2242_p7, %p2241_p4 }
 0x155   : > { %1545 = vst [vmem:[%s200_s29] sm:$0x1] %v1544_v51  ;;  %v1566_v53 = vadd.f32 %v1565_v52, %v1564_v50  ;;  %p2244_p9 = pnand %p2243_p8, %p2237_p3 }
 0x157   : > { %2247 = shalt.err (!%p2244_p9)
}
 0x158   : > { %s2248_s27 = scalar_lea.hbm %s2657_s6, 16  ;;  %s2252_s5 = scalar_lea.hbm %s2738_s3, 32 }
 0x159   : > { %p2249_p10 = scmp.ne.s32.totalorder %s2657_s6, %s2248_s27  ;;  %p2253_p13 = scmp.lt.u32.totalorder %s2657_s6, %s2738_s3 }
 0x15a   : > { %p2254_p0 = scmp.lt.u32.totalorder %s2252_s5, %s2248_s27  ;;  %p2256_p2 = scmp.lt.u32.totalorder %s2248_s27, %s2657_s6 }
 0x15b   : > { %p2250_p11 = pnand %p2249_p10, %p2400_p5 }
 0x15c   : > { %p2255_p1 = por %p2254_p0, %p2253_p13 }
 0x15d   : > { %p2251_p12 = pneg %p2250_p11 }
 0x15e   : > { %p2257_p3 = por %p2256_p2, %p2255_p1 }
 0x160   : > { %p2258_p4 = pnand %p2257_p3, %p2251_p12 }
 0x162   : > { %2261 = shalt.err (!%p2258_p4)
}
 0x163   : > { %2156 = dma.vmem_to_hbm [thread:$0]  (%p2400_p5), %s2659_s30, 16, %s2657_s6, %s2668_s10   ;;  %1567 = vst [vmem:[%s206_s12] sm:$0x1] %v1566_v53 }
 0x164   : > { %s2262_s11 = scalar_lea.vmem %s2666_s22, 16  ;;  %s2334_s13 = smov [#allocation6]  }
 0x165   : > { %p2263_p7 = scmp.ne.s32.totalorder %s2666_s22, %s2262_s11  ;;  %s2266_s14 = sshll.u32 %s2334_s13, 4  ;;  %s2267_s14 = int_to_ptr.vmem [resolvable:$false] %s2266_s14 }
 0x166   : > { %s2268_s23 = scalar_lea.vmem %s2267_s14, 32  ;;  %p2269_p10 = scmp.lt.s32.totalorder %s2666_s22, %s2267_s14 }
 0x167   : > { %p2264_p8 = pnand %p2263_p7, %p2400_p5  ;;  %p2270_p11 = scmp.lt.s32.totalorder %s2268_s23, %s2262_s11 }
 0x169   : > { %p2265_p9 = pneg %p2264_p8  ;;  %p2271_p12 = por %p2270_p11, %p2269_p10 }
 0x16b   : > { %p2272_p13 = pnand %p2271_p12, %p2265_p9 }
 0x16d   : > { %2275 = shalt.err (!%p2272_p13)
}
 0x16e   : > { %s2276_s8 = scalar_lea.hbm %s2664_s9, 16  ;;  %s2280_s6 = scalar_lea.hbm %s2739_s4, 32 }
 0x16f   : > { %p2277_p0 = scmp.ne.s32.totalorder %s2664_s9, %s2276_s8  ;;  %p2281_p3 = scmp.lt.u32.totalorder %s2664_s9, %s2739_s4 }
 0x170   : > { %p2282_p4 = scmp.lt.u32.totalorder %s2280_s6, %s2276_s8  ;;  %p2284_p8 = scmp.lt.u32.totalorder %s2276_s8, %s2664_s9 }
 0x171   : > { %p2278_p1 = pnand %p2277_p0, %p2400_p5 }
 0x172   : > { %p2283_p7 = por %p2282_p4, %p2281_p3 }
 0x173   : > { %p2279_p2 = pneg %p2278_p1 }
 0x174   : > { %p2285_p9 = por %p2284_p8, %p2283_p7 }
 0x176   : > { %p2286_p10 = pnand %p2285_p9, %p2279_p2 }
 0x178   : > { %2289 = shalt.err (!%p2286_p10)
}
 0x179   : > { %2157 = dma.vmem_to_hbm [thread:$0]  (%p2400_p5), %s2666_s22, 16, %s2664_s9, %s2668_s10  }
 0x17a PF: > { %p2171_p11 = scmp.ge.s32.totalorder %s2328_s18, 2  ;;  %s1631_s29 = sand.u32 1, %s2316_s15  }
 0x17b   : > { %s1632_s5 = scalar_lea.sflag [#allocation3], %s1631_s29 }
 0x17c   : > { %p2162_p12 = pnand %p2171_p11, %p2404_p6 }
 0x17e   : > { %2307 = dma.done.wait (!%p2162_p12), %s1632_s5, 1024  }
 0x17f   : > { %2309 = vsyncadd (!%p2162_p12), %s1632_s5, 4294966272  ;;  %s1640_s19 = sand.u32 1, %s1731_s20  }
 0x180   : > { %s1641_s7 = scalar_lea.sflag [#allocation5], %s1640_s19 }
 0x181   : > { %2311 = dma.done.wait (!%p2162_p12), %s1641_s7, 32  }
 0x182   : > { %2313 = vsyncadd (!%p2162_p12), %s1641_s7, 4294967264  ;;  %p18_p5 = scmp.ge.s32.totalorder %s2385_s21, 4   ;;  %s2742_s15 = smov %s2320_s16 }
 0x183   : > { %s2743_s16 = smov %s2324_s17  ;;  %s2744_s17 = smov %s2398_s24 }
 0x184   : > { %s2745_s18 = smov %s2385_s21  ;;  %20 = sbr.rel (!%p18_p5) target bundleno = 5 (0x5), region = 108 }
 0x18b   :  { %1653 = vsyncpa [#allocation3], 1 }
 0x18c   :  { %1655 = vsyncpa [#allocation3 + $0x1], 1 }
 0x18d   :  { %1656 = vsyncpa [#allocation5], 1 }
 0x18e   :  { %1658 = vsyncpa [#allocation5 + $0x1], 1 }

</bundles_post_ra>
